<compile_context>
chip_gen: v7x
topology: tpu7x:2x2x1
jax: 0.10.0
libtpu: 0.0.40
codegen_flags: <defaults>
</compile_context>

<pallas_src>
import functools

import jax
import jax.numpy as jnp
from jax.experimental import pallas as pl
from jax.experimental.pallas import tpu as pltpu


def _linear_kernel(z_ref, w_ref, b_ref, o_ref):
    # z_ref : (TM, H)  VMEM activation tile (f32 or bf16)
    # w_ref : (H, C)   VMEM weight, pre-transposed in the wrapper, resident
    # b_ref : (1, C)   VMEM bias (f32)
    # o_ref : (TM, C)  VMEM output tile
    acc = jnp.dot(z_ref[...], w_ref[...], preferred_element_type=jnp.float32)
    o_ref[...] = (acc + b_ref[...]).astype(o_ref.dtype)


def _device_kind():
    try:
        return jax.devices()[0].device_kind.lower()
    except Exception:
        return ""


def _auto_use_bf16():
    # bf16 MXU operands pay off on v6e/v7x; keep f32 operands on v5e/unknown.
    kind = _device_kind()
    return ("v6" in kind) or ("v7" in kind)


def _num_tensorcores():
    # v7x has 2 TensorCores per chip; earlier generations have 1.
    return 2 if "v7" in _device_kind() else 1


def _round_up(x, m):
    return ((x + m - 1) // m) * m


@functools.partial(jax.jit, static_argnames=("tile_m", "use_bf16"))
def classifier_forward(z, weight, bias, *, tile_m=None, use_bf16=None):
    """Forward of nn.Linear: z @ weight.T + bias.

    z      : (B, H) float32
    weight : (C, H) float32  (PyTorch nn.Linear convention)
    bias   : (C,)   float32
    returns: (B, C) float32
    """
    B, H = z.shape
    C = weight.shape[0]
    out_dtype = z.dtype

    if use_bf16 is None:
        use_bf16 = _auto_use_bf16()

    # One-time wrapper transpose to MXU-native (K, N) layout; reused by every
    # grid step with no in-kernel XLU work.
    w_t = weight.T                                   # (H, C)
    b2 = bias.reshape(1, C).astype(jnp.float32)      # f32 epilogue everywhere

    if use_bf16:
        z_in = z.astype(jnp.bfloat16)
        w_in = w_t.astype(jnp.bfloat16)
    else:
        z_in = z
        w_in = w_t

    # Batch tiling: large tiles to amortize the ~0.35 us per-grid-step cost;
    # on multi-TensorCore chips keep >= 2 grid steps so "parallel" can shard.
    TM_CAP = 2048
    if tile_m is not None:
        TM = min(int(tile_m), B)
    else:
        cores = _num_tensorcores()
        if cores > 1 and B > 1024:
            TM = min(TM_CAP, _round_up(pl.cdiv(B, cores), 8))
        else:
            TM = min(TM_CAP, B)
    grid = (pl.cdiv(B, TM),)

    in_bytes = 2 if use_bf16 else 4
    cost = pl.CostEstimate(
        flops=2 * B * H * C,
        transcendentals=0,
        bytes_accessed=in_bytes * (B * H + H * C) + 4 * (B * C + C),
    )

    out = pl.pallas_call(
        _linear_kernel,
        out_shape=jax.ShapeDtypeStruct((B, C), out_dtype),
        grid=grid,
        in_specs=[
            pl.BlockSpec((TM, H), lambda i: (i, 0)),   # z: tiled over batch
            pl.BlockSpec((H, C), lambda i: (0, 0)),    # weight: fully resident
            pl.BlockSpec((1, C), lambda i: (0, 0)),    # bias: fully resident
        ],
        out_specs=pl.BlockSpec((TM, C), lambda i: (i, 0)),
        compiler_params=pltpu.CompilerParams(
            dimension_semantics=("parallel",)),
        cost_estimate=cost,
    )(z_in, w_in, b2)

    return out


if __name__ == "__main__":
    # Small shapes consistent with the module: hidden_dim=32, num_class=16.
    hidden_dim = 32
    num_class = 16
    batch = 8

    key = jax.random.PRNGKey(0)
    kz, kw, kb, kz2 = jax.random.split(key, 4)

    # Deterministic PyTorch-like init: uniform(-1/sqrt(H), 1/sqrt(H)).
    bound = 1.0 / (hidden_dim ** 0.5)
    weight = jax.random.uniform(kw, (num_class, hidden_dim),
                                minval=-bound, maxval=bound, dtype=jnp.float32)
    bias = jax.random.uniform(kb, (num_class,),
                              minval=-bound, maxval=bound, dtype=jnp.float32)
    z = jax.random.normal(kz, (batch, hidden_dim), dtype=jnp.float32)

    bf16_path = _auto_use_bf16()
    atol = 5e-2 if bf16_path else 1e-5
    rtol = 5e-2 if bf16_path else 1e-5

    # Test 1: small batch, single grid step.
    out = classifier_forward(z, weight, bias)
    out = jax.block_until_ready(out)
    ref = z @ weight.T + bias
    assert out.shape == (batch, num_class)
    assert jnp.allclose(out, ref, atol=atol, rtol=rtol), "mismatch vs reference"

    # Test 2: batch not a multiple of the tile (ragged last block), tiled grid.
    batch2 = 300
    z2 = jax.random.normal(kz2, (batch2, hidden_dim), dtype=jnp.float32)
    out2 = classifier_forward(z2, weight, bias, tile_m=128)
    out2 = jax.block_until_ready(out2)
    ref2 = z2 @ weight.T + bias
    assert out2.shape == (batch2, num_class)
    assert jnp.allclose(out2, ref2, atol=atol, rtol=rtol), "ragged-block mismatch"

    print("KERNEL_OK")
</pallas_src>

<mosaic_0001>
module attributes {stable_mosaic.version = 11 : i64} {
  func.func @_linear_kernel(%arg0: i32, %arg1: memref<8x32xf32, #tpu.memory_space<vmem>>, %arg2: memref<32x16xf32, #tpu.memory_space<vmem>>, %arg3: memref<1x16xf32, #tpu.memory_space<vmem>>, %arg4: memref<8x16xf32, #tpu.memory_space<vmem>>) attributes {dimension_semantics = [#tpu.dimension_semantics<parallel>], iteration_bounds = array<i64: 1>, scalar_prefetch = 0 : i64, scratch_operands = 0 : i64, tpu.core_type = #tpu.core_type<tc>, window_params = [{transform_indices = @transform_0, window_bounds = array<i64: 8, 32>}, {pipeline_mode = #tpu.pipeline_mode<synchronous>, transform_indices = @transform_1, window_bounds = array<i64: 32, 16>}, {pipeline_mode = #tpu.pipeline_mode<synchronous>, transform_indices = @transform_2, window_bounds = array<i64: 1, 16>}, {transform_indices = @transform_3, window_bounds = array<i64: 8, 16>}]} {
    %c0 = arith.constant 0 : index
    %c0_0 = arith.constant 0 : index
    %0 = vector.load %arg1[%c0, %c0_0] : memref<8x32xf32, #tpu.memory_space<vmem>>, vector<8x32xf32>
    %c0_1 = arith.constant 0 : index
    %c0_2 = arith.constant 0 : index
    %1 = vector.load %arg2[%c0_1, %c0_2] : memref<32x16xf32, #tpu.memory_space<vmem>>, vector<32x16xf32>
    %cst = arith.constant dense<0.000000e+00> : vector<8x16xf32>
    %2 = tpu.matmul %0, %1, %cst {dimension_numbers = #tpu.dot_dimension_numbers<[1], [0], [0], [1], [0, 0, 1, 1], [], []>} : vector<8x32xf32>, vector<32x16xf32>, vector<8x16xf32> -> vector<8x16xf32>
    %c0_3 = arith.constant 0 : index
    %c0_4 = arith.constant 0 : index
    %3 = vector.load %arg3[%c0_3, %c0_4] : memref<1x16xf32, #tpu.memory_space<vmem>>, vector<1x16xf32>
    %4 = vector.broadcast %3 : vector<1x16xf32> to vector<8x16xf32>
    %5 = arith.addf %2, %4 : vector<8x16xf32>
    %c0_5 = arith.constant 0 : index
    %c0_6 = arith.constant 0 : index
    %6 = vector.load %arg4[%c0_5, %c0_6] : memref<8x16xf32, #tpu.memory_space<vmem>>, vector<8x16xf32>
    tpu.vector_store %arg4[%c0_5, %c0_6], %5 {strides = array<i32>} : memref<8x16xf32, #tpu.memory_space<vmem>>, vector<8x16xf32>,
    return
  }
  func.func @transform_0(%arg0: i32) -> (i32, i32) {
    %c0_i32 = arith.constant 0 : i32
    %c0_i32_0 = arith.constant 0 : i32
    return %arg0, %c0_i32 : i32, i32
  }
  func.func @transform_1(%arg0: i32) -> (i32, i32) {
    %c0_i32 = arith.constant 0 : i32
    %c0_i32_0 = arith.constant 0 : i32
    %c0_i32_1 = arith.constant 0 : i32
    return %c0_i32, %c0_i32_0 : i32, i32
  }
  func.func @transform_2(%arg0: i32) -> (i32, i32) {
    %c0_i32 = arith.constant 0 : i32
    %c0_i32_0 = arith.constant 0 : i32
    %c0_i32_1 = arith.constant 0 : i32
    return %c0_i32, %c0_i32_0 : i32, i32
  }
  func.func @transform_3(%arg0: i32) -> (i32, i32) {
    %c0_i32 = arith.constant 0 : i32
    %c0_i32_0 = arith.constant 0 : i32
    return %arg0, %c0_i32 : i32, i32
  }
}

</mosaic_0001>

<bundles_post_ra>
// kernel: classifier_forward.1
= control target key start
LH: loop header
LB: loop body
LE: loop exit
PB: predicated region body
PF: predicated region fallthrough
CT: control target
= control target key end

     0   :  { %v169_v3 = vmov 0.0|0.0   ;;  %vm170_vm0 = vmmov 0   ;;  %v171_v6 = vmov 0.0   ;;  %s223_s0 = inlined_call_operand.vmem [shape: f32[8,32], index: 0, kind: input, shape index: {}]   ;;  %s224_s1 = inlined_call_operand.vmem [shape: f32[32,16], index: 1, kind: input, shape index: {}]   ;;  %s225_s2 = inlined_call_operand.vmem [shape: f32[1,16], index: 2, kind: input, shape index: {}]   ;;  %s226_s3 = inlined_call_operand.hbm [shape: f32[8,16], index: 3, kind: output, shape index: {}]  }
   0x1   :  { %v16_v0 = vld [vmem:[%s224_s1] sm:$0xff]  ;;  %v17_v1 = vld [vmem:[%s224_s1 + $0x8] sm:$0xff]  ;;  %v18_v2 = vld [vmem:[%s224_s1 + $0x10] sm:$0xff]  ;;  %135 = vmatprep.subr.bf16.mxu0 %v169_v3  ;;  %132 = vmatprep.mubr.msk.f32.mxu0 %vm170_vm0, %v171_v6 }
   0x2   :  { %v136_v4 = vpack.c.bf16 %v17_v1, %v16_v0  ;;  %v19_v5 = vld [vmem:[%s224_s1 + $0x18] sm:$0xff] }
   0x3   :  { %8 = vsyncpa [#allocation3], 0  ;;  %v139_v7 = vpack.c.bf16 %v19_v5, %v18_v2  ;;  %v15_v8 = vld [vmem:[%s223_s0] sm:$0xff]  ;;  %vm27_vm1 = vcmask 261120   ;;  %s172_s24 = smov [#allocation2]   ;;  %vm101_vm2 = vcmask 130048  }
   0x4   :  { %137 = vmatpush3.bf16.msra.mxu0 %v136_v4  ;;  %v117_v9 = vld [vmem:[%s225_s2] ss:$0 sm:$0xff]  ;;  %s109_s1 = sshll.u32 %s172_s24, 4  ;;  %s110_s1 = int_to_ptr.vmem [resolvable:$true] %s109_s1 }
   0x5   :  { %138 = vmatprep.subr.bf16.mxu0 %v169_v3  ;;  %s145_s25 = scalar_lea.vmem %s110_s1, 128  ;;  %p150_p1 = scmp.lt.s32.totalorder %s110_s1, %s110_s1 }
   0x6   :  { %p146_p0 = scmp.ne.s32.totalorder %s110_s1, %s145_s25  ;;  %p151_p2 = scmp.lt.s32.totalorder %s145_s25, %s145_s25 }
   0x8   :  { %140 = vmatpush3.bf16.msra.mxu0 %v139_v7  ;;  %p152_p3 = por %p151_p2, %p150_p1 }
   0xa   :  { %p153_p4 = pnand %p152_p3, %p146_p0 }
   0xb   :  { %133 = vmatmul.mubr.msk.f32.vlgmr.msra.gmra.mrb[0].mxu0 %vm27_vm1, %v15_v8 }
  0xde   :  { %v97_v10 = vpop.f32.mrb[0].mxu0 }
  0xdf   :  { %v98_v11 = vadd.f32 %v117_v9, %v97_v10  ;;  %v134_v12 = vpop.f32.mrb[1].mxu0 }
  0xe1   :  { %102 = vst.msk [vmem:[#allocation2] sm:$0xff] %vm101_vm2, %v98_v11 }
  0xe2   :  { %156 = shalt.err (!%p153_p4)
}
  0xe3   :  { %s157_s27 = scalar_lea.hbm %s226_s3, 128 }
  0xe4   :  { %p158_p5 = scmp.ne.s32.totalorder %s226_s3, %s157_s27  ;;  %p161_p6 = scmp.lt.u32.totalorder %s157_s27, %s226_s3 }
  0xe6   :  { %p163_p7 = pnand %p161_p6, %p158_p5 }
  0xe8   :  { %166 = shalt.err (!%p163_p7)
}
  0xe9   :  { %112 = dma.vmem_to_hbm [thread:$0]  %s110_s1, 128, %s226_s3, [#allocation3]  }
  0xea   :  { %167 = dma.done.wait [#allocation3], 128  }
  0xeb   :  { %168 = vsyncadd [#allocation3], 4294967168 }
  0xec   :  { %116 = vsyncpa [#allocation3], 1 }

</bundles_post_ra>
